<compile_context>
chip_gen: v7x
topology: tpu7x:2x2x1
jax: 0.10.0
libtpu: 0.0.40
codegen_flags: <defaults>
</compile_context>

<pallas_src>
import functools

import jax
import jax.numpy as jnp
from jax.experimental import pallas as pl
from jax.experimental.pallas import tpu as pltpu


def _round_up(n, m):
    return ((n + m - 1) // m) * m


def _cdiv(a, b):
    return -(-a // b)


# ---------------------------------------------------------------------------
# Pallas kernel: fused (Linear -> exact GELU -> Linear) for ONE projector.
# grid = (row-tile i ["parallel"], N-tile j over llama_size ["arbitrary"])
#   x_ref  : (tm, feat_p)     bf16  (row block, resident across j)
#   w1_ref : (feat_p, hid_p)  bf16  (resident)
#   b1_ref : (1, hid_p)       f32
#   w2_ref : (hid_p, tn)      bf16  (streamed / double-buffered along j)
#   b2_ref : (1, tn)          f32
#   o_ref  : (tm, tn)         bf16
#   h_ref  : (tm, hid_p)      bf16 VMEM scratch (hidden-activation cache)
# ---------------------------------------------------------------------------
def _projector_kernel(x_ref, w1_ref, b1_ref, w2_ref, b2_ref, o_ref, h_ref):
    # First dense + exact GELU computed once per row tile (N-tile j == 0),
    # cached in VMEM scratch and reused for every N tile of the second dense.
    # NOTE: only valid while the N-tile axis stays the innermost, sequentially
    # iterated ("arbitrary") grid axis.
    @pl.when(pl.program_id(1) == 0)
    def _():
        h = jnp.dot(x_ref[...], w1_ref[...],
                    preferred_element_type=jnp.float32) + b1_ref[...]
        # exact GELU (PyTorch nn.GELU default): 0.5 * x * (1 + erf(x / sqrt(2)))
        h = 0.5 * h * (1.0 + jax.lax.erf(h * jnp.float32(0.7071067811865476)))
        h_ref[...] = h.astype(jnp.bfloat16)

    y = jnp.dot(h_ref[...], w2_ref[...],
                preferred_element_type=jnp.float32) + b2_ref[...]
    o_ref[...] = y.astype(o_ref.dtype)


# ---------------------------------------------------------------------------
# One-time parameter prep: pad + cast weights.  No per-forward weight copies.
# ---------------------------------------------------------------------------
def _padded_out_dim(out, tn_target):
    """Pad `out` so a lane-dense tile close to tn_target divides it exactly."""
    tn_target = max(128, (tn_target // 128) * 128)
    out_128 = _round_up(out, 128)
    nt = max(1, _cdiv(out_128, tn_target))
    tn = _round_up(_cdiv(out_128, nt), 128)
    return nt * tn


def prepare_projector_params(w1, b1, w2, b2, *, tn=2048):
    """w1:[feat,hid] b1:[hid] w2:[hid,out] b2:[out] (f32) -> padded bf16/f32.

    feat / hid pad only to 16 (bf16 sublane / full-extent dims); the output
    (lane) dim pads so an N tile near `tn` divides it exactly.
    """
    feat, hid = w1.shape
    out = w2.shape[1]
    feat_p = _round_up(feat, 16)
    hid_p = _round_up(hid, 16)
    out_p = _padded_out_dim(out, tn)
    w1p = jnp.zeros((feat_p, hid_p), jnp.bfloat16).at[:feat, :hid].set(
        w1.astype(jnp.bfloat16))
    b1p = jnp.zeros((1, hid_p), jnp.float32).at[0, :hid].set(b1.astype(jnp.float32))
    w2p = jnp.zeros((hid_p, out_p), jnp.bfloat16).at[:hid, :out].set(
        w2.astype(jnp.bfloat16))
    b2p = jnp.zeros((1, out_p), jnp.float32).at[0, :out].set(b2.astype(jnp.float32))
    return w1p, b1p, w2p, b2p


# ---------------------------------------------------------------------------
# Wrapper: one pallas_call running one projector over its own row count.
# ---------------------------------------------------------------------------
def fused_projector(x, prepared, *, tn=2048, tm_max=256):
    """Apply a prepared (Linear -> GELU -> Linear) projector to x [rows, feat].

    Returns [rows, out_p] bf16 (slice the valid out columns in the caller).
    """
    w1p, b1p, w2p, b2p = prepared
    feat_p, hid_p = w1p.shape
    out_p = w2p.shape[1]
    rows, feat = x.shape

    # Row tiling: 16-row (bf16 sublane) granularity; tile so large candidate
    # batches pipeline / shard across cores instead of one huge block.
    rows_16 = _round_up(max(rows, 1), 16)
    tm = min(tm_max, rows_16)
    rows_p = _round_up(rows_16, tm)

    # Lane-dense N tile: largest multiple of 128 <= tn dividing out_p
    # (prepare_projector_params padded out_p so this stays close to tn).
    tn_eff = max(128, (min(tn, out_p) // 128) * 128)
    while out_p % tn_eff != 0:
        tn_eff -= 128

    # Pad activations (tiny; the big weight tensors are already prepared).
    xp = jnp.zeros((rows_p, feat_p), jnp.bfloat16).at[:rows, :feat].set(
        x.astype(jnp.bfloat16))

    y = pl.pallas_call(
        _projector_kernel,
        out_shape=jax.ShapeDtypeStruct((rows_p, out_p), jnp.bfloat16),
        grid_spec=pltpu.PrefetchScalarGridSpec(
            num_scalar_prefetch=0,
            grid=(rows_p // tm, out_p // tn_eff),
            in_specs=[
                pl.BlockSpec((tm, feat_p), lambda i, j: (i, 0)),      # x rows
                pl.BlockSpec((feat_p, hid_p), lambda i, j: (0, 0)),   # w1 (resident)
                pl.BlockSpec((1, hid_p), lambda i, j: (0, 0)),        # b1
                pl.BlockSpec((hid_p, tn_eff), lambda i, j: (0, j)),   # w2 (streamed)
                pl.BlockSpec((1, tn_eff), lambda i, j: (0, j)),       # b2
            ],
            out_specs=pl.BlockSpec((tm, tn_eff), lambda i, j: (i, j)),
            scratch_shapes=[pltpu.VMEM((tm, hid_p), jnp.bfloat16)],
        ),
        compiler_params=pltpu.CompilerParams(
            dimension_semantics=("parallel", "arbitrary")),
    )(xp, w1p, b1p, w2p, b2p)

    return y[:rows]


# ---------------------------------------------------------------------------
# Forward (the numeric part of TKGLLMEVO.forward): gather TKG features and
# project them into the LLaMA embedding space.
# ---------------------------------------------------------------------------
def tkgllm_feature_forward(history_embedding, rel_embed, event_id, candidates_id,
                           proj_evo_prepared, proj_prepared, *, llama_size, tn=2048):
    """
    history_embedding : [num_ent, feat_dim]   (from tkg_model.predict)
    rel_embed         : [num_rel, feat_dim]
    event_id          : [B, 5]  int32  (subject, relation, object, ts, index)
    candidates_id     : [B, 1+k] int32 (first column ignored, as in reference)

    Returns (bf16, in llama embedding space):
      evo_embedding   : [B, llama_size]     projector_evo(history[event_id[:,0]])
      rel_embedding   : [B, llama_size]     projector    (rel_embed[event_id[:,1]])
      label_embedding : [B, llama_size]     projector_evo(history[event_id[:,2]])
      cand_embeddings : [B, k, llama_size]  projector_evo(history[candidates_id[:,1:]])
    """
    B = event_id.shape[0]
    k = candidates_id.shape[1] - 1
    feat = history_embedding.shape[1]

    # --- glue: gather rows by index (plain JAX) -----------------------------
    evo_rows = history_embedding[event_id[:, 0]]                       # [B, feat]
    label_rows = history_embedding[event_id[:, 2]]                     # [B, feat]
    cand_rows = history_embedding[candidates_id[:, 1:]].reshape(B * k, feat)
    rel_rows = rel_embed[event_id[:, 1]]                               # [B, feat]

    evo_stack = jnp.concatenate([evo_rows, label_rows, cand_rows], axis=0)  # [B*(2+k), feat]

    # --- hot path: fused MLPs, each with its own row count -------------------
    evo_out = fused_projector(evo_stack, proj_evo_prepared, tn=tn)[:, :llama_size]
    rel_out = fused_projector(rel_rows, proj_prepared, tn=tn)[:, :llama_size]

    return {
        "evo_embedding": evo_out[:B],
        "label_embedding": evo_out[B:2 * B],
        "cand_embeddings": evo_out[2 * B:].reshape(B, k, llama_size),
        "rel_embedding": rel_out,
    }


# ---------------------------------------------------------------------------
# Deterministic parameter init (xavier-normal weights, zero bias — like the
# `init()` hook applied to nn.Linear in the reference module)
# ---------------------------------------------------------------------------
def xavier_normal(key, fan_in, fan_out):
    std = jnp.sqrt(2.0 / (fan_in + fan_out))
    return jax.random.normal(key, (fan_in, fan_out), dtype=jnp.float32) * std


def make_projector_params(key, feat_dim, out_dim):
    k1, k2 = jax.random.split(key)
    w1 = xavier_normal(k1, feat_dim, 2 * feat_dim)
    b1 = jnp.zeros((2 * feat_dim,), jnp.float32)
    w2 = xavier_normal(k2, 2 * feat_dim, out_dim)
    b2 = jnp.zeros((out_dim,), jnp.float32)
    return w1, b1, w2, b2


def mlp_ref_bf16(x, w1, b1, w2, b2):
    """Pure-JAX reference reproducing the kernel's bf16-compute / f32-accumulate."""
    h = jnp.dot(x.astype(jnp.bfloat16), w1.astype(jnp.bfloat16),
                preferred_element_type=jnp.float32) + b1
    h = 0.5 * h * (1.0 + jax.lax.erf(h * 0.7071067811865476))
    h = h.astype(jnp.bfloat16)
    return jnp.dot(h, w2.astype(jnp.bfloat16),
                   preferred_element_type=jnp.float32) + b2


if __name__ == "__main__":
    key = jax.random.PRNGKey(0)
    k_hist, k_rel, k_pevo, k_p = jax.random.split(key, 4)

    # small shapes consistent with the module
    B = 2             # batch
    num_ent = 16
    num_rel = 8
    feat_dim = 32     # conf['h_dim']
    llama_size = 512  # llama hidden size (kept small for the test)
    k_cand = 4        # conf['num_candidate']
    TN = 256          # N-tile so the grid actually pipelines (2 tiles here)

    history_embedding = jax.random.normal(k_hist, (num_ent, feat_dim), jnp.float32)
    rel_embed = jax.random.normal(k_rel, (num_rel, feat_dim), jnp.float32)

    event_id = jnp.array([[3, 1, 7, 0, 0],
                          [5, 4, 2, 1, 1]], dtype=jnp.int32)
    candidates_id = jnp.array([[0, 1, 9, 11, 4],
                               [0, 6, 3, 15, 8]], dtype=jnp.int32)

    proj_evo_raw = make_projector_params(k_pevo, feat_dim, llama_size)
    proj_raw = make_projector_params(k_p, feat_dim, llama_size)

    # one-time padding / bf16 cast of the weights (no per-call weight copies)
    proj_evo_prep = prepare_projector_params(*proj_evo_raw, tn=TN)
    proj_prep = prepare_projector_params(*proj_raw, tn=TN)

    fwd = jax.jit(functools.partial(tkgllm_feature_forward,
                                    llama_size=llama_size, tn=TN))
    out = fwd(history_embedding, rel_embed, event_id, candidates_id,
              proj_evo_prep, proj_prep)
    out = jax.tree_util.tree_map(jax.block_until_ready, out)

    # correctness check vs. pure-JAX reference (same bf16 rounding as kernel)
    ref_evo = mlp_ref_bf16(history_embedding[event_id[:, 0]], *proj_evo_raw)
    ref_rel = mlp_ref_bf16(rel_embed[event_id[:, 1]], *proj_raw)
    ref_lab = mlp_ref_bf16(history_embedding[event_id[:, 2]], *proj_evo_raw)
    ref_cand = mlp_ref_bf16(
        history_embedding[candidates_id[:, 1:]].reshape(B * k_cand, feat_dim),
        *proj_evo_raw).reshape(B, k_cand, llama_size)

    def close(a, b):
        return jnp.allclose(a.astype(jnp.float32), b, atol=2e-2, rtol=2e-2)

    assert close(out["evo_embedding"], ref_evo)
    assert close(out["rel_embedding"], ref_rel)
    assert close(out["label_embedding"], ref_lab)
    assert close(out["cand_embeddings"], ref_cand)

    print("KERNEL_OK")
</pallas_src>

<mosaic_0001>
module attributes {stable_mosaic.version = 11 : i64} {
  func.func @_projector_kernel(%arg0: i32, %arg1: i32, %arg2: memref<16x32xbf16, #tpu.memory_space<vmem>>, %arg3: memref<32x64xbf16, #tpu.memory_space<vmem>>, %arg4: memref<1x64xf32, #tpu.memory_space<vmem>>, %arg5: memref<64x256xbf16, #tpu.memory_space<vmem>>, %arg6: memref<1x256xf32, #tpu.memory_space<vmem>>, %arg7: memref<16x256xbf16, #tpu.memory_space<vmem>>, %arg8: memref<16x64xbf16, #tpu.memory_space<vmem>>) attributes {dimension_semantics = [#tpu.dimension_semantics<parallel>, #tpu.dimension_semantics<arbitrary>], iteration_bounds = array<i64: 1, 2>, scalar_prefetch = 0 : i64, scratch_operands = 1 : i64, tpu.core_type = #tpu.core_type<tc>, window_params = [{transform_indices = @transform_0, window_bounds = array<i64: 16, 32>}, {pipeline_mode = #tpu.pipeline_mode<synchronous>, transform_indices = @transform_1, window_bounds = array<i64: 32, 64>}, {pipeline_mode = #tpu.pipeline_mode<synchronous>, transform_indices = @transform_2, window_bounds = array<i64: 1, 64>}, {transform_indices = @transform_3, window_bounds = array<i64: 64, 256>}, {transform_indices = @transform_4, window_bounds = array<i64: 1, 256>}, {transform_indices = @transform_5, window_bounds = array<i64: 16, 256>}]} {
    %c0_i32 = arith.constant 0 : i32
    %0 = arith.cmpi eq, %arg1, %c0_i32 : i32
    %1 = arith.extui %0 : i1 to i32
    %c0_i32_0 = arith.constant 0 : i32
    %2 = arith.cmpi ne, %1, %c0_i32_0 : i32
    scf.if %2 {
      %c0_8 = arith.constant 0 : index
      %c0_9 = arith.constant 0 : index
      %11 = vector.load %arg2[%c0_8, %c0_9] : memref<16x32xbf16, #tpu.memory_space<vmem>>, vector<16x32xbf16>
      %c0_10 = arith.constant 0 : index
      %c0_11 = arith.constant 0 : index
      %12 = vector.load %arg3[%c0_10, %c0_11] : memref<32x64xbf16, #tpu.memory_space<vmem>>, vector<32x64xbf16>
      %cst_12 = arith.constant dense<0.000000e+00> : vector<16x64xf32>
      %13 = tpu.matmul %11, %12, %cst_12 {dimension_numbers = #tpu.dot_dimension_numbers<[1], [0], [0], [1], [0, 0, 1, 1], [], []>} : vector<16x32xbf16>, vector<32x64xbf16>, vector<16x64xf32> -> vector<16x64xf32>
      %c0_13 = arith.constant 0 : index
      %c0_14 = arith.constant 0 : index
      %14 = vector.load %arg4[%c0_13, %c0_14] : memref<1x64xf32, #tpu.memory_space<vmem>>, vector<1x64xf32>
      %15 = vector.broadcast %14 : vector<1x64xf32> to vector<16x64xf32>
      %16 = arith.addf %13, %15 : vector<16x64xf32>
      %cst_15 = arith.constant 5.000000e-01 : f32
      %17 = vector.broadcast %cst_15 : f32 to vector<16x64xf32>
      %18 = arith.mulf %17, %16 : vector<16x64xf32>
      %cst_16 = arith.constant 0.707106769 : f32
      %19 = vector.broadcast %cst_16 : f32 to vector<16x64xf32>
      %20 = arith.mulf %16, %19 : vector<16x64xf32>
      %21 = math.erf %20 : vector<16x64xf32>
      %cst_17 = arith.constant 1.000000e+00 : f32
      %22 = vector.broadcast %cst_17 : f32 to vector<16x64xf32>
      %23 = arith.addf %22, %21 : vector<16x64xf32>
      %24 = arith.mulf %18, %23 : vector<16x64xf32>
      %25 = arith.truncf %24 : vector<16x64xf32> to vector<16x64xbf16>
      %c0_18 = arith.constant 0 : index
      %c0_19 = arith.constant 0 : index
      %26 = vector.load %arg8[%c0_18, %c0_19] : memref<16x64xbf16, #tpu.memory_space<vmem>>, vector<16x64xbf16>
      tpu.vector_store %arg8[%c0_18, %c0_19], %25 {strides = array<i32>} : memref<16x64xbf16, #tpu.memory_space<vmem>>, vector<16x64xbf16>,
    } else {
    }
    %c0 = arith.constant 0 : index
    %c0_1 = arith.constant 0 : index
    %3 = vector.load %arg8[%c0, %c0_1] : memref<16x64xbf16, #tpu.memory_space<vmem>>, vector<16x64xbf16>
    %c0_2 = arith.constant 0 : index
    %c0_3 = arith.constant 0 : index
    %4 = vector.load %arg5[%c0_2, %c0_3] : memref<64x256xbf16, #tpu.memory_space<vmem>>, vector<64x256xbf16>
    %cst = arith.constant dense<0.000000e+00> : vector<16x256xf32>
    %5 = tpu.matmul %3, %4, %cst {dimension_numbers = #tpu.dot_dimension_numbers<[1], [0], [0], [1], [0, 0, 1, 1], [], []>} : vector<16x64xbf16>, vector<64x256xbf16>, vector<16x256xf32> -> vector<16x256xf32>
    %c0_4 = arith.constant 0 : index
    %c0_5 = arith.constant 0 : index
    %6 = vector.load %arg6[%c0_4, %c0_5] : memref<1x256xf32, #tpu.memory_space<vmem>>, vector<1x256xf32>
    %7 = vector.broadcast %6 : vector<1x256xf32> to vector<16x256xf32>
    %8 = arith.addf %5, %7 : vector<16x256xf32>
    %9 = arith.truncf %8 : vector<16x256xf32> to vector<16x256xbf16>
    %c0_6 = arith.constant 0 : index
    %c0_7 = arith.constant 0 : index
    %10 = vector.load %arg7[%c0_6, %c0_7] : memref<16x256xbf16, #tpu.memory_space<vmem>>, vector<16x256xbf16>
    tpu.vector_store %arg7[%c0_6, %c0_7], %9 {strides = array<i32>} : memref<16x256xbf16, #tpu.memory_space<vmem>>, vector<16x256xbf16>,
    return
  }
  func.func @transform_0(%arg0: i32, %arg1: i32) -> (i32, i32) {
    %c0_i32 = arith.constant 0 : i32
    %c0_i32_0 = arith.constant 0 : i32
    return %arg0, %c0_i32 : i32, i32
  }
  func.func @transform_1(%arg0: i32, %arg1: i32) -> (i32, i32) {
    %c0_i32 = arith.constant 0 : i32
    %c0_i32_0 = arith.constant 0 : i32
    %c0_i32_1 = arith.constant 0 : i32
    return %c0_i32, %c0_i32_0 : i32, i32
  }
  func.func @transform_2(%arg0: i32, %arg1: i32) -> (i32, i32) {
    %c0_i32 = arith.constant 0 : i32
    %c0_i32_0 = arith.constant 0 : i32
    %c0_i32_1 = arith.constant 0 : i32
    return %c0_i32, %c0_i32_0 : i32, i32
  }
  func.func @transform_3(%arg0: i32, %arg1: i32) -> (i32, i32) {
    %c0_i32 = arith.constant 0 : i32
    %c0_i32_0 = arith.constant 0 : i32
    return %c0_i32, %arg1 : i32, i32
  }
  func.func @transform_4(%arg0: i32, %arg1: i32) -> (i32, i32) {
    %c0_i32 = arith.constant 0 : i32
    %c0_i32_0 = arith.constant 0 : i32
    return %c0_i32, %arg1 : i32, i32
  }
  func.func @transform_5(%arg0: i32, %arg1: i32) -> (i32, i32) {
    %c0_i32 = arith.constant 0 : i32
    return %arg0, %arg1 : i32, i32
  }
}

</mosaic_0001>

<bundles_post_ra>
// kernel: tkgllm_feature_forward.2
= control target key start
LH: loop header
LB: loop body
LE: loop exit
PB: predicated region body
PF: predicated region fallthrough
CT: control target
= control target key end

     0   :  { %s880_s18 = smov 0   ;;  %s882_s19 = smov 0   ;;  %s993_s0 = inlined_call_operand.vmem [shape: bf16[16,32], index: 0, kind: input, shape index: {}]   ;;  %s994_s1 = inlined_call_operand.vmem [shape: bf16[32,64], index: 1, kind: input, shape index: {}]   ;;  %s995_s2 = inlined_call_operand.vmem [shape: f32[1,64], index: 2, kind: input, shape index: {}]   ;;  %s996_s3 = inlined_call_operand.vmem [shape: bf16[64,512], index: 3, kind: input, shape index: {}]   ;;  %s997_s4 = inlined_call_operand.vmem [shape: f32[1,512], index: 4, kind: input, shape index: {}]   ;;  %s998_s5 = inlined_call_operand.vmem [shape: bf16[16,512], index: 5, kind: output, shape index: {}]  }
   0x1   :  { %s884_s20 = smov 0   ;;  %s886_s21 = smov 0  }
   0x2   :  { %s888_s22 = smov 0  }
   0x3 LB: > { %s24_s23 = sadd.s32 1, %s841_s21  ;;  %s696_s24 = sadd.s32 4294967295, %s845_s22   ;;  %s845_s22 = sphi %s888_s22, %s15_s22   ;;  %s841_s21 = sphi %s886_s21, %s1003_s21   ;;  %s837_s20 = sphi %s884_s20, %s1002_s20   ;;  %s833_s19 = sphi %s882_s19, %s1001_s19   ;;  %s829_s18 = sphi %s880_s18, %s1000_s18  }
   0x4   : > { %p25_p0 = scmp.ge.s32.totalorder %s24_s23, 2  ;;  %p109_p1 = scmp.ne.s32.totalorder %s833_s19, %s829_s18 }
   0x5   : > { %p110_p2 = scmp.eq.s32.totalorder %s845_s22, 0  ;;  %p167_p4 = scmp.eq.s32.totalorder %s696_s24, 1 }
   0x6   : > { %s1005_s23 = smov (%p25_p0, %s24_s23), 0  ;;  %s102_s26 = sadd.s32 1, %s833_s19 }
   0x7   : > { %p111_p3 = por %p110_p2, %p109_p1  ;;  %s99_s25 = ssub.s32 %s841_s21, %s1005_s23 }
   0x8   : > { %p100_p5 = scmp.eq.s32.totalorder %s99_s25, 0  ;;  %p915_p6 = por %p167_p4, %p109_p1 }
   0x9   : > { %p700_p7 = scmp.ge.s32.totalorder %s845_s22, 2 }
   0xa   : > { %s920_s28 = scalar_select %p100_p5, %s833_s19, %s102_s26  }
   0xb   : > { %204 = sbr.rel (%p700_p7) target bundleno = 26 (0x1a), region = 28 }
  0x12   : > { %207 = sbr.rel (!%p111_p3) target bundleno = 26 (0x1a), region = 32  ;;  %s209_s29 = sand.u32 (%p111_p3), 1, %s833_s19  }
  0x13   : > { %s730_s30 = sshll.u32 (%p111_p3), %s841_s21, 3  ;;  %s701_s6 = sshll.u32 (%p111_p3), %s209_s29, 6 }
  0x14   : > { %s214_s9 = scalar_lea.vmem (%p111_p3), %s996_s3, %s730_s30  ;;  %s211_s10 = scalar_lea.vmem (%p111_p3), [#allocation3], %s701_s6 }
  0x15   : > { %v256_v0 = vld [vmem:[%s214_s9] sm:$0xff] (%p111_p3)  ;;  %v258_v1 = vld [vmem:[%s214_s9 + $0x10] sm:$0xff] (%p111_p3) }
  0x16   : > { %v260_v2 = vld [vmem:[%s214_s9 + $0x20] sm:$0xff] (%p111_p3)  ;;  %257 = vst [vmem:[%s211_s10] sm:$0xff] (%p111_p3), %v256_v0  ;;  %259 = vst [vmem:[%s211_s10 + $0x8] sm:$0xff] (%p111_p3), %v258_v1  ;;  %v262_v3 = vld [vmem:[%s214_s9 + $0x30] sm:$0xff] (%p111_p3) }
  0x17   : > { %261 = vst [vmem:[%s211_s10 + $0x10] sm:$0xff] (%p111_p3), %v260_v2  ;;  %v264_v4 = vld [vmem:[%s214_s9 + $0x40] sm:$0xff] (%p111_p3)  ;;  %v266_v5 = vld [vmem:[%s214_s9 + $0x50] sm:$0xff] (%p111_p3)  ;;  %263 = vst [vmem:[%s211_s10 + $0x18] sm:$0xff] (%p111_p3), %v262_v3 }
  0x18   : > { %265 = vst [vmem:[%s211_s10 + $0x20] sm:$0xff] (%p111_p3), %v264_v4  ;;  %267 = vst [vmem:[%s211_s10 + $0x28] sm:$0xff] (%p111_p3), %v266_v5  ;;  %v268_v6 = vld [vmem:[%s214_s9 + $0x60] sm:$0xff] (%p111_p3)  ;;  %v270_v7 = vld [vmem:[%s214_s9 + $0x70] sm:$0xff] (%p111_p3) }
  0x19   : > { %269 = vst [vmem:[%s211_s10 + $0x30] sm:$0xff] %v268_v6  ;;  %271 = vst [vmem:[%s211_s10 + $0x38] sm:$0xff] %v270_v7 }
  0x1a PF: > { %p704_p8 = scmp.ge.s32.totalorder %s845_s22, 1  ;;  %p284_p9 = scmp.lt.s32.totalorder %s845_s22, 3 }
  0x1c   : > { %p285_p10 = pnand %p704_p8, %p284_p9 }
  0x1d   : > { %s291_s11 = sand.u32 (!%p285_p10), 1, %s829_s18   ;;  %s707_s12 = sshll.u32 (!%p285_p10), %s837_s20, 1 }
  0x1e   : > { %288 = sbr.rel (%p285_p10) target bundleno = 528 (0x210), region = 74  ;;  %s705_s13 = sshll.u32 (!%p285_p10), %s291_s11, 6 }
  0x1f   : > { %s706_s14 = sshll.u32 (!%p285_p10), %s291_s11, 4  ;;  %p334_p11 = scmp.lt.s32.totalorder (!%p285_p10), %s707_s12, 3 }
  0x20   : > { %s938_s24 = scalar_lea.vmem (!%p285_p10), [#allocation3], %s705_s13  ;;  %s940_s25 = scalar_lea.vmem (!%p285_p10), [#allocation4], %s706_s14 }
  0x21   : > { %p708_p12 = scmp.ne.s32.totalorder (!%p285_p10), %s837_s20, 0 }
  0x25   : > { %s1007_s12 = smov (!%p334_p11, %s707_s12), 3  ;;  %344 = sbr.rel (%p708_p12) target bundleno = 283 (0x11b), region = 82 }
  0x26   : > { %s336_s17 = scalar_lea.vmem %s997_s4, %s1007_s12  ;;  %v788_v8 = vld [vmem:[%s994_s1] sm:$0xff] (!%p708_p12)   ;;  %v847_v9 = vmov (!%p708_p12), 0.0   ;;  %v789_v10 = vld [vmem:[%s994_s1 + $0x8] sm:$0xff] (!%p708_p12)   ;;  %vm848_vm0 = vmmov (!%p708_p12), 0   ;;  %vm375_vm1 = vcmask (!%p708_p12), 261120   ;;  %vm431_vm2 = vcmask (!%p708_p12), 523264  }
  0x27   : > { %737 = vmatprep.subr.bf16.mxu0 (!%p708_p12), %v847_v9  ;;  %741 = vmatprep.mubr.msk.bf16.mxu0 (!%p708_p12), %vm848_vm0, %v847_v9  ;;  %v790_v11 = vld [vmem:[%s993_s0] sm:$0xff] (!%p708_p12)  }
  0x28   : > { %738 = vmatpush3.bf16.msra.mxu0 (!%p708_p12), %v788_v8  ;;  %v709_v12 = vld [vmem:[%s995_s2] ss:$0 sm:$0xff] (!%p708_p12) }
  0x29   : > { %739 = vmatprep.subr.bf16.mxu0 (!%p708_p12), %v847_v9 }
  0x2c   : > { %740 = vmatpush3.bf16.msra.mxu0 %v789_v10 }
  0x2f   : > { %742 = vmatmul.mubr.msk.bf16.vlgmr.msra.gmra.mrb[0].mxu0 %vm375_vm1, %v790_v11 }
 0x102   : > { %v413_v13 = vpop.f32.mrb[0].mxu0 }
 0x103   : > { %v414_v14 = vadd.f32 %v709_v12, %v413_v13  ;;  %v743_v15 = vpop.f32.mrb[1].mxu0 }
 0x104   : > { %v416_v16 = vpop.f32.mrb[2].mxu0 }
 0x105   : > { %v422_v17 = vmul.f32 0.70710677, %v414_v14  ;;  %v417_v18 = vadd.f32 %v709_v12, %v416_v16  ;;  %v744_v19 = vpop.f32.mrb[3].mxu0  ;;  %v420_v24 = vmul.f32 0.5, %v414_v14 }
 0x107   : > { %791 = verf.f32 %v422_v17  ;;  %v423_v20 = vmul.f32 0.70710677, %v417_v18  ;;  %v421_v25 = vmul.f32 0.5, %v417_v18 }
 0x109   : > { %793 = verf.f32 %v423_v20 }
 0x111   : > { %v792_v21 = vpop.eup %791 }
 0x112   : > { %v426_v22 = vadd.f32 1.0, %v792_v21 }
 0x113   : > { %v794_v23 = vpop.eup %793 }
 0x114   : > { %v427_v26 = vadd.f32 1.0, %v794_v23  ;;  %v428_v27 = vmul.f32 %v426_v22, %v420_v24 }
 0x116   : > { %v429_v28 = vmul.f32 %v427_v26, %v421_v25 }
 0x118   : > { %v430_v29 = vpack.c.bf16 %v429_v28, %v428_v27 }
 0x11a   : > { %432 = vst.msk [vmem:[#allocation2] sm:$0xff] %vm431_vm2, %v430_v29 }
 0x11b PF: > { %v795_v30 = vld [vmem:[%s938_s24 + $0x4] ss:$8 sps:$4 sm:$0xff]   ;;  %v797_v31 = vld [vmem:[%s938_s24] ss:$8 sps:$4 sm:$0xff]   ;;  %v849_v32 = vmov 0   ;;  %vm494_vm3 = vcmask 523264   ;;  %v444_v40 = vlaneseq }
 0x11c   : > { %530 = vmatprep.mubr.bf16.mxu0 %v849_v32  ;;  %498 = vmatprep.subr.bf16.mxu0 %v795_v30  ;;  %v798_v33 = vld [vmem:[%s938_s24 + $0x14] ss:$8 sps:$4 sm:$0xff]   ;;  %v800_v34 = vld [vmem:[%s938_s24 + $0x10] ss:$8 sps:$4 sm:$0xff]   ;;  %v801_v35 = vld [vmem:[%s938_s24 + $0x24] ss:$8 sps:$4 sm:$0xff]  }
 0x11d   : > { %499 = vmatpush1.bf16.msra.mxu0 %v797_v31  ;;  %v803_v36 = vld [vmem:[%s938_s24 + $0x20] ss:$8 sps:$4 sm:$0xff]   ;;  %v804_v37 = vld [vmem:[%s938_s24 + $0x34] ss:$8 sps:$4 sm:$0xff]   ;;  %v806_v38 = vld [vmem:[%s938_s24 + $0x30] ss:$8 sps:$4 sm:$0xff]  }
 0x11e   : > { %500 = vmatprep.subr.bf16.mxu0 %v798_v33  ;;  %v445_v41 = vshrl.u32 %v444_v40, 7  ;;  %v442_v43 = vld [vmem:[%s336_s17] sm:$0x3]  ;;  %s733_s12 = sshll.u32 (%p915_p6), %s837_s20, 3 }
 0x11f   : > { %s567_s15 = scalar_lea.vmem (%p915_p6), %s998_s5, %s733_s12 }
 0x120   : > { %v446_v42 = vsub.s32 0, %v445_v41  ;;  %v450_v44 = vsub.s32 1, %v445_v41 }
 0x121   : > { %501 = vmatpush1.bf16.msra.mxu0 %v800_v34  ;;  %v433_v39 = vld [vmem:[#allocation2] sm:$0xff] }
 0x122   : > { %502 = vmatprep.subr.bf16.mxu0 %v801_v35  ;;  %v447_v45 = vrot.slane %v442_v43, %v446_v42  ;;  %v451_v46 = vrot.slane %v442_v43, %v450_v44 }
 0x125   : > { %503 = vmatpush1.bf16.msra.mxu0 %v803_v36 }
 0x126   : > { %504 = vmatprep.subr.bf16.mxu0 %v804_v37 }
 0x129   : > { %505 = vmatpush1.bf16.msra.mxu0 %v806_v38 }
 0x12c   : > { %722 = vmatmul.mubr.msk.bf16.vlgmr.msra.gmra.mrb[0].mxu0 %vm494_vm3, %v433_v39 }
 0x1ff   : > { %v532_v47 = vpop.f32.mrb[0].mxu0 }
 0x200   : > { %v533_v48 = vadd.f32 %v532_v47, %v447_v45  ;;  %v534_v49 = vpop.f32.mrb[1].mxu0 }
 0x201   : > { %v535_v50 = vadd.f32 %v534_v49, %v451_v46  ;;  %v536_v51 = vpop.f32.mrb[2].mxu0  ;;  %561 = sbr.rel (!%p915_p6) target bundleno = 528 (0x210), region = 86 }
 0x202   : > { %v537_v52 = vadd.f32 %v536_v51, %v447_v45  ;;  %v538_v53 = vpop.f32.mrb[3].mxu0 }
 0x203   : > { %v731_v54 = vpack.c.bf16 %v535_v50, %v533_v48  ;;  %v539_v55 = vadd.f32 %v538_v53, %v451_v46 }
 0x205   : > { %553 = vst [vmem:[%s940_s25] sm:$0xff] %v731_v54  ;;  %v732_v56 = vpack.c.bf16 %v539_v55, %v537_v52 }
 0x207   : > { %554 = vst [vmem:[%s940_s25 + $0x8] sm:$0xff] %v732_v56 }
 0x20c   : > { %v597_v57 = vld [vmem:[%s940_s25] sm:$0xff] }
 0x20d   : > { %598 = vst [vmem:[%s567_s15] sm:$0xff] %v597_v57 }
 0x20e   : > { %v599_v58 = vld [vmem:[%s940_s25 + $0x8] sm:$0xff] }
 0x20f   : > { %600 = vst [vmem:[%s567_s15 + $0x10] sm:$0xff] %v599_v58 }
 0x210 PF: > { %s15_s22 = sadd.s32 1, %s845_s22   ;;  %s1000_s18 = smov %s833_s19 }
 0x211   : > { %p12_p13 = scmp.ge.s32.totalorder %s15_s22, 4   ;;  %s1001_s19 = smov %s920_s28 }
 0x212   : > { %s1002_s20 = smov %s841_s21  ;;  %s1003_s21 = smov %s1005_s23 }
 0x213   :  { %14 = sbr.rel (!%p12_p13) target bundleno = 3 (0x3), region = 161 }

</bundles_post_ra>
